<compile_context>
chip_gen: v7x
topology: tpu7x:2x2x1
jax: 0.10.0
libtpu: 0.0.40
codegen_flags: <defaults>
</compile_context>

<pallas_src>
import functools
import math

import jax
import jax.numpy as jnp
from jax.experimental import pallas as pl
from jax.experimental.pallas import tpu as pltpu


def _round_up(a: int, b: int) -> int:
    return -(-a // b) * b


def _gelu_tanh(h):
    # tanh approximation -> EUP tanh slot; matches exact-erf GELU to ~1e-3.
    c = 0.7978845608028654  # sqrt(2/pi)
    return 0.5 * h * (1.0 + jnp.tanh(c * (h + 0.044715 * h * h * h)))


def _chip_defaults():
    """(tile_rows, tile_hidden, vmem_limit_bytes) per TPU generation."""
    try:
        kind = jax.devices()[0].device_kind.lower()
    except Exception:  # pragma: no cover
        kind = ""
    if "v7" in kind:
        # 64 MiB physical VMEM per TC: leave headroom for compiler scratch/semaphores,
        # TM=384 > ~310 FLOP/B knee -> compute-bound.
        return 384, 512, 56 * 1024 * 1024
    if "v6" in kind:
        # 128 MiB VMEM; ~700 FLOP/B knee -> big row tiles, big K chunks.
        return 768, 1024, 100 * 1024 * 1024
    if "v5" in kind:
        # 128 MiB VMEM; ~240 FLOP/B knee.
        return 512, 1024, 100 * 1024 * 1024
    return 256, 512, 64 * 1024 * 1024


# --------------------------- kernels ------------------------------------------
def _mlp_kernel_resident(x_ref, w1_ref, b1_ref, w2_ref, b2_ref, o_ref, *, eps):
    """Whole W1/W2 resident in VMEM; grid = (row_tiles,)."""
    x = x_ref[...].astype(jnp.float32)                       # (TM, E)
    mean = jnp.mean(x, axis=-1, keepdims=True)
    centered = x - mean
    var = jnp.mean(centered * centered, axis=-1, keepdims=True)
    xn = centered * jax.lax.rsqrt(var + eps)                 # gamma/beta folded into W1/b1

    h = jnp.dot(xn.astype(jnp.bfloat16), w1_ref[...],
                preferred_element_type=jnp.float32)          # (TM, M)
    h = _gelu_tanh(h + b1_ref[...].astype(jnp.float32))
    # Dropout(p) -> identity in eval mode.
    out = jnp.dot(h.astype(jnp.bfloat16), w2_ref[...],
                  preferred_element_type=jnp.float32)        # (TM, E)
    # Dropout(p) -> identity in eval mode.
    o_ref[...] = (out + b2_ref[...].astype(jnp.float32)).astype(o_ref.dtype)


def _mlp_kernel_stream(x_ref, w1_ref, b1_ref, w2_ref, b2_ref, o_ref, xn_ref, *, eps):
    """Grid = (row_tiles, hidden_chunks).  Axis 1 streams the MLP hidden dimension;
    the f32 output tile is resident across it and serves as the accumulator."""
    k = pl.program_id(1)
    nk = pl.num_programs(1)

    # --- k == 0: LayerNorm (f32) -> cache normalized rows in bf16, zero the output ---
    @pl.when(k == 0)
    def _():
        x = x_ref[...].astype(jnp.float32)                   # (TM, E)
        mean = jnp.mean(x, axis=-1, keepdims=True)
        centered = x - mean
        var = jnp.mean(centered * centered, axis=-1, keepdims=True)
        xn = centered * jax.lax.rsqrt(var + eps)
        xn_ref[...] = xn.astype(xn_ref.dtype)                # bf16 cache for the MXU
        o_ref[...] = jnp.zeros_like(o_ref)                   # resident f32 accumulator

    # --- Linear(E -> TK chunk) on the MXU (bf16 in, f32 accumulate) ---
    h = jnp.dot(xn_ref[...], w1_ref[...], preferred_element_type=jnp.float32)
    h = _gelu_tanh(h + b1_ref[...].astype(jnp.float32))       # (TM, TK) in f32
    # Dropout(p) -> identity in eval mode.

    # --- Linear(TK chunk -> E), accumulate into the resident output tile ---
    o_ref[...] += jnp.dot(h.astype(jnp.bfloat16), w2_ref[...],
                          preferred_element_type=jnp.float32)
    # Dropout(p) -> identity in eval mode.

    # --- last chunk: add output bias in place ---
    @pl.when(k == nk - 1)
    def _():
        o_ref[...] = o_ref[...] + b2_ref[...].astype(jnp.float32)


# --------------------------- wrapper ------------------------------------------
def mlp_layer(x, gamma, beta, w1, b1, w2, b2, *, eps=1e-5,
              tile_rows=None, tile_hidden=None, vmem_limit_bytes=None,
              force_stream=False):
    """x: (B, S, E) float32.  Weights in (in, out) layout: W1 (E, M), W2 (M, E).

    Tile sizes and the VMEM limit default per TPU generation (see _chip_defaults);
    pass explicit values to override.  force_stream=True skips the resident-weight
    fast path (used in tests to exercise the hidden-dim streaming path).
    """
    B, S, E = x.shape
    M = w1.shape[1]
    N = B * S
    assert E % 128 == 0, "embedding dim must be lane-aligned (multiple of 128)"
    assert M % 128 == 0, "mlp hidden dim must be lane-aligned (multiple of 128)"

    d_tm, d_tk, d_cap = _chip_defaults()
    tile_rows = d_tm if tile_rows is None else tile_rows
    tile_hidden = d_tk if tile_hidden is None else tile_hidden
    cap = d_cap if vmem_limit_bytes is None else vmem_limit_bytes

    # --- fold the LayerNorm affine into the first linear (exact) -----------------
    #   (xn*gamma + beta) @ W1 + b1  ==  xn @ (diag(gamma) @ W1) + (beta @ W1 + b1)
    w1f = (w1 * gamma[:, None]).astype(jnp.bfloat16)            # (E, M) bf16
    b1f = (beta @ w1 + b1).reshape(1, M).astype(jnp.float32)    # (1, M) f32
    w2b = w2.astype(jnp.bfloat16)                               # (M, E) bf16
    b2f = b2.reshape(1, E).astype(jnp.float32)                  # (1, E) f32

    # Row tile: MXU/bf16-aligned, no larger than the (padded) row count.
    TM = _round_up(min(tile_rows, _round_up(N, 128)), 128)

    # ---------------- resident-weight fast path ----------------------------------
    # Whole bf16 W1/W2 + one row tile (x, out double-buffered, hidden slab) in VMEM.
    resident_bytes = (2 * E * M * 2                 # W1 + W2 (bf16)
                      + 4 * TM * E * 4              # x + out tiles, double-buffered f32
                      + TM * M * (4 + 2)            # hidden slab f32 + bf16 copy
                      + (M + E) * 4)                # biases
    if not force_stream and resident_bytes <= int(0.8 * cap):
        N_pad = _round_up(N, TM)
        x2d = x.reshape(N, E)
        if N_pad != N:
            x2d = jnp.pad(x2d, ((0, N_pad - N), (0, 0)))
        row_tiles = N_pad // TM
        cost = pl.CostEstimate(
            flops=4 * N_pad * E * M,
            transcendentals=N_pad * M,
            bytes_accessed=N_pad * E * 4 * 2 + 2 * E * M * 2 + (M + E) * 4,
        )
        out = pl.pallas_call(
            functools.partial(_mlp_kernel_resident, eps=eps),
            out_shape=jax.ShapeDtypeStruct((N_pad, E), jnp.float32),
            grid_spec=pltpu.PrefetchScalarGridSpec(
                num_scalar_prefetch=0,
                grid=(row_tiles,),
                in_specs=[
                    pl.BlockSpec((TM, E), lambda i: (i, 0)),    # x rows
                    pl.BlockSpec((E, M), lambda i: (0, 0)),     # W1 (resident)
                    pl.BlockSpec((1, M), lambda i: (0, 0)),     # b1
                    pl.BlockSpec((M, E), lambda i: (0, 0)),     # W2 (resident)
                    pl.BlockSpec((1, E), lambda i: (0, 0)),     # b2
                ],
                out_specs=pl.BlockSpec((TM, E), lambda i: (i, 0)),
            ),
            compiler_params=pltpu.CompilerParams(
                dimension_semantics=("parallel",),
                vmem_limit_bytes=int(min(cap, max(32 * 1024 * 1024, 2 * resident_bytes))),
            ),
            cost_estimate=cost,
        )(x2d, w1f, b1f, w2b, b2f)
        return out[:N].reshape(B, S, E).astype(x.dtype)

    # ---------------- hidden-dim streaming path -----------------------------------
    # Pick TK: largest 128-multiple <= tile_hidden that divides M.
    TK = max(128, (min(tile_hidden, M) // 128) * 128)
    while M % TK != 0:
        TK -= 128

    def est_vmem(tm, tk):
        return (2 * tm * E * 4            # x tiles (f32, double-buffered)
                + 2 * tm * E * 4          # out tiles (f32)
                + 2 * E * tk * 2          # W1 chunks (bf16)
                + 2 * tk * E * 2          # W2 chunks (bf16)
                + 2 * tk * 4 + 2 * E * 4  # bias chunks
                + tm * E * 2)             # xn cache (bf16)

    # Shrink tiles until they fit the per-chip VMEM budget with headroom.
    while est_vmem(TM, TK) > int(0.85 * cap):
        if TM > 128:
            TM -= 128
        elif TK > 128:
            nt = TK - 128
            while nt > 128 and M % nt != 0:
                nt -= 128
            TK = nt
        else:
            break

    N_pad = _round_up(N, TM)
    x2d = x.reshape(N, E)
    if N_pad != N:
        # zero rows: LN stays finite (rsqrt(eps)); padded rows are discarded below.
        x2d = jnp.pad(x2d, ((0, N_pad - N), (0, 0)))
    row_tiles = N_pad // TM
    grid = (row_tiles, M // TK)                                 # reduction axis last

    cost = pl.CostEstimate(
        flops=4 * N_pad * E * M,                                # two matmuls
        transcendentals=N_pad * M,                              # one tanh per hidden elem
        # Weights are re-streamed from HBM once per row tile.
        bytes_accessed=(N_pad * E * 4 * 2
                        + row_tiles * (E * M + M * E) * 2
                        + row_tiles * (M + E) * 4),
    )

    out = pl.pallas_call(
        functools.partial(_mlp_kernel_stream, eps=eps),
        out_shape=jax.ShapeDtypeStruct((N_pad, E), jnp.float32),  # f32: accumulated in place
        grid_spec=pltpu.PrefetchScalarGridSpec(
            num_scalar_prefetch=0,
            grid=grid,
            in_specs=[
                pl.BlockSpec((TM, E), lambda i, k: (i, 0)),     # x rows (constant over k)
                pl.BlockSpec((E, TK), lambda i, k: (0, k)),     # W1 chunk (streams over k)
                pl.BlockSpec((1, TK), lambda i, k: (0, k)),     # b1 chunk
                pl.BlockSpec((TK, E), lambda i, k: (k, 0)),     # W2 chunk (streams over k)
                pl.BlockSpec((1, E), lambda i, k: (0, 0)),      # b2
                # If a profile shows exposed weight-DMA waits on v6e, add
                # pipeline_mode=pl.Buffered(3) to the two weight specs.
            ],
            out_specs=pl.BlockSpec((TM, E), lambda i, k: (i, 0)),  # resident across k
            scratch_shapes=[
                pltpu.VMEM((TM, E), jnp.bfloat16),              # cached normalized rows
            ],
        ),
        compiler_params=pltpu.CompilerParams(
            dimension_semantics=("parallel", "arbitrary"),      # rows shard across TCs
            vmem_limit_bytes=int(min(cap, max(32 * 1024 * 1024, 2 * est_vmem(TM, TK)))),
        ),
        cost_estimate=cost,
    )(x2d, w1f, b1f, w2b, b2f)

    return out[:N].reshape(B, S, E).astype(x.dtype)


# ----------------------------- references ---------------------------------------
def reference_mlp_exact(x, gamma, beta, w1, b1, w2, b2, eps=1e-5):
    """Exact f32 / erf-GELU reference matching the PyTorch module (eval mode)."""
    mean = jnp.mean(x, -1, keepdims=True)
    var = jnp.mean((x - mean) ** 2, -1, keepdims=True)
    xn = (x - mean) * jax.lax.rsqrt(var + eps) * gamma + beta
    h = xn @ w1 + b1
    h = 0.5 * h * (1.0 + jax.lax.erf(h * (1.0 / math.sqrt(2.0))))
    return h @ w2 + b2


def reference_mlp_kernel_numerics(x, gamma, beta, w1, b1, w2, b2, eps=1e-5):
    """Mirror of the kernel's numerics (bf16 matmul inputs, f32 accum, tanh GELU)."""
    mean = jnp.mean(x, -1, keepdims=True)
    var = jnp.mean((x - mean) ** 2, -1, keepdims=True)
    xn = ((x - mean) * jax.lax.rsqrt(var + eps)).astype(jnp.bfloat16)
    w1f = (w1 * gamma[:, None]).astype(jnp.bfloat16)
    b1f = beta @ w1 + b1
    w2b = w2.astype(jnp.bfloat16)
    h = jnp.dot(xn, w1f, preferred_element_type=jnp.float32) + b1f
    c = 0.7978845608028654
    h = 0.5 * h * (1.0 + jnp.tanh(c * (h + 0.044715 * h * h * h)))
    return jnp.dot(h.astype(jnp.bfloat16), w2b, preferred_element_type=jnp.float32) + b2


if __name__ == "__main__":
    # Small shapes consistent with the module (embedding_dim=128, mlp_size=256).
    B, S, E, M = 2, 8, 128, 256
    key = jax.random.PRNGKey(0)
    kx, kg, kb, kw1, kb1, kw2, kb2 = jax.random.split(key, 7)

    x = jax.random.normal(kx, (B, S, E), dtype=jnp.float32)
    gamma = 1.0 + 0.1 * jax.random.normal(kg, (E,), dtype=jnp.float32)
    beta = 0.1 * jax.random.normal(kb, (E,), dtype=jnp.float32)
    w1 = jax.random.normal(kw1, (E, M), dtype=jnp.float32) * (1.0 / math.sqrt(E))
    b1 = 0.01 * jax.random.normal(kb1, (M,), dtype=jnp.float32)
    w2 = jax.random.normal(kw2, (M, E), dtype=jnp.float32) * (1.0 / math.sqrt(M))
    b2 = 0.01 * jax.random.normal(kb2, (E,), dtype=jnp.float32)

    ref_k = reference_mlp_kernel_numerics(x, gamma, beta, w1, b1, w2, b2)
    ref_e = reference_mlp_exact(x, gamma, beta, w1, b1, w2, b2)

    # 1) Default (auto) path: per-chip defaults -> resident-weight kernel at this size.
    out_auto = jax.block_until_ready(mlp_layer(x, gamma, beta, w1, b1, w2, b2))
    assert out_auto.shape == (B, S, E)
    assert jnp.allclose(out_auto, ref_k, atol=2e-3, rtol=2e-3), "auto path: mismatch vs kernel-numerics ref"
    assert jnp.allclose(out_auto, ref_e, atol=7.5e-2, rtol=7.5e-2), "auto path: mismatch vs exact ref"

    # 2) Forced streaming path with tile_hidden=128 to exercise the multi-chunk (k)
    #    accumulation into the resident output tile.
    out_stream = jax.block_until_ready(
        mlp_layer(x, gamma, beta, w1, b1, w2, b2,
                  tile_rows=256, tile_hidden=128, force_stream=True))
    assert out_stream.shape == (B, S, E)
    assert jnp.allclose(out_stream, ref_k, atol=2e-3, rtol=2e-3), "stream path: mismatch vs kernel-numerics ref"
    assert jnp.allclose(out_stream, ref_e, atol=7.5e-2, rtol=7.5e-2), "stream path: mismatch vs exact ref"

    print("KERNEL_OK")
</pallas_src>

<mosaic_0001>
module attributes {stable_mosaic.version = 11 : i64} {
  func.func @_mlp_kernel_resident(%arg0: i32, %arg1: memref<128x128xf32, #tpu.memory_space<vmem>>, %arg2: memref<128x256xbf16, #tpu.memory_space<vmem>>, %arg3: memref<1x256xf32, #tpu.memory_space<vmem>>, %arg4: memref<256x128xbf16, #tpu.memory_space<vmem>>, %arg5: memref<1x128xf32, #tpu.memory_space<vmem>>, %arg6: memref<128x128xf32, #tpu.memory_space<vmem>>) attributes {dimension_semantics = [#tpu.dimension_semantics<parallel>], iteration_bounds = array<i64: 1>, scalar_prefetch = 0 : i64, scratch_operands = 0 : i64, tpu.core_type = #tpu.core_type<tc>, window_params = [{transform_indices = @transform_0, window_bounds = array<i64: 128, 128>}, {pipeline_mode = #tpu.pipeline_mode<synchronous>, transform_indices = @transform_1, window_bounds = array<i64: 128, 256>}, {pipeline_mode = #tpu.pipeline_mode<synchronous>, transform_indices = @transform_2, window_bounds = array<i64: 1, 256>}, {pipeline_mode = #tpu.pipeline_mode<synchronous>, transform_indices = @transform_3, window_bounds = array<i64: 256, 128>}, {pipeline_mode = #tpu.pipeline_mode<synchronous>, transform_indices = @transform_4, window_bounds = array<i64: 1, 128>}, {transform_indices = @transform_5, window_bounds = array<i64: 128, 128>}]} {
    %c0 = arith.constant 0 : index
    %c0_0 = arith.constant 0 : index
    %0 = vector.load %arg1[%c0, %c0_0] : memref<128x128xf32, #tpu.memory_space<vmem>>, vector<128x128xf32>
    %cst = arith.constant dense<0.000000e+00> : vector<128xf32>
    %1 = vector.multi_reduction <add>, %0, %cst [1] : vector<128x128xf32> to vector<128xf32>
    %2 = vector.shape_cast %1 : vector<128xf32> to vector<128x1xf32>
    %cst_1 = arith.constant 1.280000e+02 : f32
    %3 = vector.broadcast %cst_1 : f32 to vector<128x1xf32>
    %4 = arith.divf %2, %3 : vector<128x1xf32>
    %5 = vector.broadcast %4 : vector<128x1xf32> to vector<128x128xf32>
    %6 = arith.subf %0, %5 : vector<128x128xf32>
    %7 = arith.mulf %6, %6 : vector<128x128xf32>
    %cst_2 = arith.constant dense<0.000000e+00> : vector<128xf32>
    %8 = vector.multi_reduction <add>, %7, %cst_2 [1] : vector<128x128xf32> to vector<128xf32>
    %9 = vector.shape_cast %8 : vector<128xf32> to vector<128x1xf32>
    %cst_3 = arith.constant 1.280000e+02 : f32
    %10 = vector.broadcast %cst_3 : f32 to vector<128x1xf32>
    %11 = arith.divf %9, %10 : vector<128x1xf32>
    %cst_4 = arith.constant 9.99999974E-6 : f32
    %12 = vector.broadcast %cst_4 : f32 to vector<128x1xf32>
    %13 = arith.addf %11, %12 : vector<128x1xf32>
    %14 = math.rsqrt %13 : vector<128x1xf32>
    %15 = vector.broadcast %14 : vector<128x1xf32> to vector<128x128xf32>
    %16 = arith.mulf %6, %15 : vector<128x128xf32>
    %17 = arith.truncf %16 : vector<128x128xf32> to vector<128x128xbf16>
    %c0_5 = arith.constant 0 : index
    %c0_6 = arith.constant 0 : index
    %18 = vector.load %arg2[%c0_5, %c0_6] : memref<128x256xbf16, #tpu.memory_space<vmem>>, vector<128x256xbf16>
    %cst_7 = arith.constant dense<0.000000e+00> : vector<128x256xf32>
    %19 = tpu.matmul %17, %18, %cst_7 {dimension_numbers = #tpu.dot_dimension_numbers<[1], [0], [0], [1], [0, 0, 1, 1], [], []>} : vector<128x128xbf16>, vector<128x256xbf16>, vector<128x256xf32> -> vector<128x256xf32>
    %c0_8 = arith.constant 0 : index
    %c0_9 = arith.constant 0 : index
    %20 = vector.load %arg3[%c0_8, %c0_9] : memref<1x256xf32, #tpu.memory_space<vmem>>, vector<1x256xf32>
    %21 = vector.broadcast %20 : vector<1x256xf32> to vector<128x256xf32>
    %22 = arith.addf %19, %21 : vector<128x256xf32>
    %cst_10 = arith.constant 5.000000e-01 : f32
    %23 = vector.broadcast %cst_10 : f32 to vector<128x256xf32>
    %24 = arith.mulf %23, %22 : vector<128x256xf32>
    %cst_11 = arith.constant 4.471500e-02 : f32
    %25 = vector.broadcast %cst_11 : f32 to vector<128x256xf32>
    %26 = arith.mulf %25, %22 : vector<128x256xf32>
    %27 = arith.mulf %26, %22 : vector<128x256xf32>
    %28 = arith.mulf %27, %22 : vector<128x256xf32>
    %29 = arith.addf %22, %28 : vector<128x256xf32>
    %cst_12 = arith.constant 0.797884583 : f32
    %30 = vector.broadcast %cst_12 : f32 to vector<128x256xf32>
    %31 = arith.mulf %30, %29 : vector<128x256xf32>
    %32 = math.tanh %31 : vector<128x256xf32>
    %cst_13 = arith.constant 1.000000e+00 : f32
    %33 = vector.broadcast %cst_13 : f32 to vector<128x256xf32>
    %34 = arith.addf %33, %32 : vector<128x256xf32>
    %35 = arith.mulf %24, %34 : vector<128x256xf32>
    %36 = arith.truncf %35 : vector<128x256xf32> to vector<128x256xbf16>
    %c0_14 = arith.constant 0 : index
    %c0_15 = arith.constant 0 : index
    %37 = vector.load %arg4[%c0_14, %c0_15] : memref<256x128xbf16, #tpu.memory_space<vmem>>, vector<256x128xbf16>
    %cst_16 = arith.constant dense<0.000000e+00> : vector<128x128xf32>
    %38 = tpu.matmul %36, %37, %cst_16 {dimension_numbers = #tpu.dot_dimension_numbers<[1], [0], [0], [1], [0, 0, 1, 1], [], []>} : vector<128x256xbf16>, vector<256x128xbf16>, vector<128x128xf32> -> vector<128x128xf32>
    %c0_17 = arith.constant 0 : index
    %c0_18 = arith.constant 0 : index
    %39 = vector.load %arg5[%c0_17, %c0_18] : memref<1x128xf32, #tpu.memory_space<vmem>>, vector<1x128xf32>
    %40 = vector.broadcast %39 : vector<1x128xf32> to vector<128x128xf32>
    %41 = arith.addf %38, %40 : vector<128x128xf32>
    %c0_19 = arith.constant 0 : index
    %c0_20 = arith.constant 0 : index
    %42 = vector.load %arg6[%c0_19, %c0_20] : memref<128x128xf32, #tpu.memory_space<vmem>>, vector<128x128xf32>
    tpu.vector_store %arg6[%c0_19, %c0_20], %41 {strides = array<i32>} : memref<128x128xf32, #tpu.memory_space<vmem>>, vector<128x128xf32>,
    return
  }
  func.func @transform_0(%arg0: i32) -> (i32, i32) {
    %c0_i32 = arith.constant 0 : i32
    %c0_i32_0 = arith.constant 0 : i32
    return %arg0, %c0_i32 : i32, i32
  }
  func.func @transform_1(%arg0: i32) -> (i32, i32) {
    %c0_i32 = arith.constant 0 : i32
    %c0_i32_0 = arith.constant 0 : i32
    %c0_i32_1 = arith.constant 0 : i32
    return %c0_i32, %c0_i32_0 : i32, i32
  }
  func.func @transform_2(%arg0: i32) -> (i32, i32) {
    %c0_i32 = arith.constant 0 : i32
    %c0_i32_0 = arith.constant 0 : i32
    %c0_i32_1 = arith.constant 0 : i32
    return %c0_i32, %c0_i32_0 : i32, i32
  }
  func.func @transform_3(%arg0: i32) -> (i32, i32) {
    %c0_i32 = arith.constant 0 : i32
    %c0_i32_0 = arith.constant 0 : i32
    %c0_i32_1 = arith.constant 0 : i32
    return %c0_i32, %c0_i32_0 : i32, i32
  }
  func.func @transform_4(%arg0: i32) -> (i32, i32) {
    %c0_i32 = arith.constant 0 : i32
    %c0_i32_0 = arith.constant 0 : i32
    %c0_i32_1 = arith.constant 0 : i32
    return %c0_i32, %c0_i32_0 : i32, i32
  }
  func.func @transform_5(%arg0: i32) -> (i32, i32) {
    %c0_i32 = arith.constant 0 : i32
    %c0_i32_0 = arith.constant 0 : i32
    return %arg0, %c0_i32 : i32, i32
  }
}

</mosaic_0001>

<bundles_post_ra>
// kernel: tpu_custom_call.1
= control target key start
LH: loop header
LB: loop body
LE: loop exit
PB: predicated region body
PF: predicated region fallthrough
CT: control target
= control target key end

     0   :  { %10 = vsyncpa [#allocation3], 0  ;;  %s1905_s0 = inlined_call_operand.hbm [shape: f32[128,128], index: 0, kind: input, shape index: {}]   ;;  %s1906_s1 = inlined_call_operand.hbm [shape: bf16[128,256], index: 1, kind: input, shape index: {}]   ;;  %s1907_s2 = inlined_call_operand.vmem [shape: f32[1,256], index: 2, kind: input, shape index: {}]   ;;  %s1908_s3 = inlined_call_operand.hbm [shape: bf16[256,128], index: 3, kind: input, shape index: {}]   ;;  %s1909_s4 = inlined_call_operand.vmem [shape: f32[1,128], index: 4, kind: input, shape index: {}]   ;;  %s1910_s5 = inlined_call_operand.hbm [shape: f32[128,128], index: 5, kind: output, shape index: {}]  }
   0x1   :  { %11 = vsyncpa [#allocation6], 0 }
   0x2   :  { %12 = vsyncpa [#allocation4], 0  ;;  %s1391_s18 = smov [#allocation5]   ;;  %s1392_s20 = smov [#allocation2]  }
   0x3   :  { %s30_s19 = sshll.u32 %s1391_s18, 4  ;;  %s18_s21 = sshll.u32 %s1392_s20, 4  ;;  %s31_s19 = int_to_ptr.vmem [resolvable:$true] %s30_s19  ;;  %s1430_s21 = int_to_ptr.vmem [resolvable:$true] %s18_s21 }
   0x4   :  { %s1297_s24 = scalar_lea.hbm %s1906_s1, 2048 }
   0x5   :  { %p1298_p0 = scmp.ne.s32.totalorder %s1906_s1, %s1297_s24  ;;  %p1301_p1 = scmp.lt.u32.totalorder %s1297_s24, %s1906_s1 }
   0x7   :  { %p1303_p2 = pnand %p1301_p1, %p1298_p0 }
   0x9   :  { %1306 = shalt.err (!%p1303_p2)
}
   0xa   :  { %s1307_s29 = scalar_lea.vmem %s31_s19, 2048  ;;  %p1312_p4 = scmp.lt.s32.totalorder %s31_s19, %s31_s19 }
   0xb   :  { %p1308_p3 = scmp.ne.s32.totalorder %s31_s19, %s1307_s29  ;;  %p1313_p5 = scmp.lt.s32.totalorder %s1307_s29, %s1307_s29 }
   0xd   :  { %p1314_p6 = por %p1313_p5, %p1312_p4 }
   0xf   :  { %p1315_p7 = pnand %p1314_p6, %p1308_p3 }
  0x11   :  { %1318 = shalt.err (!%p1315_p7)
}
  0x12   :  { %s1393_s30 = smov 128   ;;  %s1394_s6 = smov 8  }
  0x13   :  { %36 = dma.hbm_to_vmem [thread:$0]  %s1906_s1, 2048, %s31_s19, [#allocation6], %s1393_s30, %s1393_s30, %s1394_s6  }
  0x14   :  { %s1319_s11 = scalar_lea.hbm %s1905_s0, 2048 }
  0x15   :  { %p1320_p8 = scmp.ne.s32.totalorder %s1905_s0, %s1319_s11  ;;  %p1323_p9 = scmp.lt.u32.totalorder %s1319_s11, %s1905_s0 }
  0x17   :  { %p1325_p10 = pnand %p1323_p9, %p1320_p8 }
  0x19   :  { %1328 = shalt.err (!%p1325_p10)
}
  0x1a   :  { %s1329_s16 = scalar_lea.vmem %s1430_s21, 2048  ;;  %p1334_p12 = scmp.lt.s32.totalorder %s1430_s21, %s1430_s21 }
  0x1b   :  { %p1330_p11 = scmp.ne.s32.totalorder %s1430_s21, %s1329_s16  ;;  %p1335_p13 = scmp.lt.s32.totalorder %s1329_s16, %s1329_s16 }
  0x1d   :  { %p1336_p0 = por %p1335_p13, %p1334_p12 }
  0x1f   :  { %p1337_p1 = pnand %p1336_p0, %p1330_p11 }
  0x21   :  { %1340 = shalt.err (!%p1337_p1)
}
  0x22   :  { %24 = dma.hbm_to_vmem [thread:$0]  %s1905_s0, 2048, %s1430_s21, [#allocation3], %s1393_s30, %s1393_s30, %s1394_s6  }
  0x23   :  { %s1395_s18 = smov [#allocation7]   ;;  %s1341_s23 = scalar_lea.hbm %s1908_s3, 2048 }
  0x24   :  { %s44_s19 = sshll.u32 %s1395_s18, 4  ;;  %p1342_p2 = scmp.ne.s32.totalorder %s1908_s3, %s1341_s23  ;;  %s45_s19 = int_to_ptr.vmem [resolvable:$true] %s44_s19 }
  0x25   :  { %p1345_p3 = scmp.lt.u32.totalorder %s1341_s23, %s1908_s3 }
  0x27   :  { %p1347_p4 = pnand %p1345_p3, %p1342_p2 }
  0x29   :  { %1350 = shalt.err (!%p1347_p4)
}
  0x2a   :  { %s1351_s28 = scalar_lea.vmem %s45_s19, 2048  ;;  %p1356_p6 = scmp.lt.s32.totalorder %s45_s19, %s45_s19 }
  0x2b   :  { %p1352_p5 = scmp.ne.s32.totalorder %s45_s19, %s1351_s28  ;;  %p1357_p7 = scmp.lt.s32.totalorder %s1351_s28, %s1351_s28 }
  0x2d   :  { %p1358_p8 = por %p1357_p7, %p1356_p6 }
  0x2f   :  { %p1359_p9 = pnand %p1358_p8, %p1352_p5 }
  0x31   :  { %1362 = shalt.err (!%p1359_p9)
}
  0x32   :  { %s1396_s0 = smov 64   ;;  %s1397_s21 = smov 4  }
  0x33   :  { %50 = dma.hbm_to_vmem [thread:$0]  %s1908_s3, 2048, %s45_s19, [#allocation6], %s1396_s0, %s1396_s0, %s1397_s21  }
  0x34   :  { %1385 = dma.done.wait [#allocation3], 2048  }
  0x35   :  { %1386 = vsyncadd [#allocation3], 4294965248 }
  0x36   :  { %1387 = dma.done.wait [#allocation6], 4096  }
  0x37   :  { %1388 = vsyncadd [#allocation6], 4294963200  ;;  %v63_v0 = vld [vmem:[#allocation2] sm:$0xff]  ;;  %v65_v1 = vld [vmem:[#allocation2 + $0x10] sm:$0xff] }
  0x38   :  { %79 = vadd.xlane.f32.xlu0 %v63_v0  ;;  %83 = vadd.xlane.f32.xlu1 %v65_v1  ;;  %v64_v2 = vld [vmem:[#allocation2 + $0x8] sm:$0xff]  ;;  %v66_v3 = vld [vmem:[#allocation2 + $0x18] sm:$0xff]  ;;  %v67_v4 = vld [vmem:[#allocation2 + $0x20] sm:$0xff] }
  0x39   :  { %v68_v5 = vld [vmem:[#allocation2 + $0x28] sm:$0xff]  ;;  %v69_v6 = vld [vmem:[#allocation2 + $0x30] sm:$0xff]  ;;  %v1479_v7 = vld [vmem:[#allocation2 + $0x38] sm:$0xff] }
  0x3a   :  { %v1481_v8 = vld [vmem:[#allocation2 + $0x40] sm:$0xff]  ;;  %v1483_v9 = vld [vmem:[#allocation2 + $0x48] sm:$0xff]  ;;  %v1486_v10 = vld [vmem:[#allocation2 + $0x50] sm:$0xff] }
  0x3b   :  { %v1488_v11 = vld [vmem:[#allocation2 + $0x58] sm:$0xff]  ;;  %v1494_v12 = vld [vmem:[#allocation2 + $0x60] sm:$0xff]  ;;  %v1496_v13 = vld [vmem:[#allocation2 + $0x68] sm:$0xff] }
  0x3c   :  { %81 = vadd.xlane.f32.xlu0 %v64_v2  ;;  %85 = vadd.xlane.f32.xlu1 %v66_v3  ;;  %v1500_v14 = vld [vmem:[#allocation2 + $0x70] sm:$0xff]  ;;  %v1502_v15 = vld [vmem:[#allocation2 + $0x78] sm:$0xff]  ;;  %v1161_v16 = vld [vmem:[#allocation5 + $0x4] ss:$8 sps:$4 sm:$0xff]  }
  0x3d   :  { %v1163_v17 = vld [vmem:[#allocation5] ss:$8 sps:$4 sm:$0xff]   ;;  %v1164_v18 = vld [vmem:[#allocation5 + $0x14] ss:$8 sps:$4 sm:$0xff]   ;;  %372 = vmatprep.subr.bf16.mxu0 %v1161_v16  ;;  %v1166_v19 = vld [vmem:[#allocation5 + $0x10] ss:$8 sps:$4 sm:$0xff]  }
  0x3e   :  { %373 = vmatpush1.bf16.msra.mxu0 %v1163_v17  ;;  %v1167_v20 = vld [vmem:[#allocation5 + $0x24] ss:$8 sps:$4 sm:$0xff]   ;;  %v1169_v59 = vld [vmem:[#allocation5 + $0x20] ss:$8 sps:$4 sm:$0xff]  }
  0x3f   :  { %374 = vmatprep.subr.bf16.mxu0 %v1164_v18  ;;  %v1173_v18 = vld [vmem:[#allocation5 + $0x44] ss:$8 sps:$4 sm:$0xff]  }
  0x40   :  { %87 = vadd.xlane.f32.xlu0 %v67_v4  ;;  %89 = vadd.xlane.f32.xlu1 %v68_v5 }
  0x42   :  { %375 = vmatpush1.bf16.msra.mxu0 %v1166_v19 }
  0x43   :  { %376 = vmatprep.subr.bf16.mxu0 %v1167_v20 }
  0x44   :  { %91 = vadd.xlane.f32.xlu0 %v69_v6  ;;  %93 = vadd.xlane.f32.xlu1 %v1479_v7 }
  0x46   :  { %377 = vmatpush1.bf16.msra.mxu0 %v1169_v59 }
  0x48   :  { %95 = vadd.xlane.f32.xlu0 %v1481_v8  ;;  %97 = vadd.xlane.f32.xlu1 %v1483_v9 }
  0x4c   :  { %99 = vadd.xlane.f32.xlu0 %v1486_v10  ;;  %101 = vadd.xlane.f32.xlu1 %v1488_v11 }
  0x50   :  { %103 = vadd.xlane.f32.xlu0 %v1494_v12  ;;  %105 = vadd.xlane.f32.xlu1 %v1496_v13 }
  0x54   :  { %107 = vadd.xlane.f32.xlu0 %v1500_v14  ;;  %109 = vadd.xlane.f32.xlu1 %v1502_v15 }
  0xc5   :  { %v80_v21 = vpop.xlane.xlu0 %79  ;;  %v84_v22 = vpop.xlane.xlu1 %83 }
  0xc6   :  { %v112_v23 = vmul.f32 0.0078125, %v80_v21  ;;  %v114_v24 = vmul.f32 0.0078125, %v84_v22  ;;  %v1175_v21 = vld [vmem:[#allocation5 + $0x40] ss:$8 sps:$4 sm:$0xff]  }
  0xc8   :  { %v1506_v25 = vsub.f32 %v63_v0, %v112_v23  ;;  %v1508_v26 = vsub.f32 %v65_v1, %v114_v24  ;;  %v1170_v1 = vld [vmem:[#allocation5 + $0x34] ss:$8 sps:$4 sm:$0xff]  }
  0xc9   :  { %v82_v27 = vpop.xlane.xlu0 %81  ;;  %v86_v28 = vpop.xlane.xlu1 %85  ;;  %378 = vmatprep.subr.bf16.mxu0 %v1170_v1 }
  0xca   :  { %v113_v29 = vmul.f32 0.0078125, %v82_v27  ;;  %v144_v30 = vmul.f32 %v1506_v25, %v1506_v25  ;;  %v115_v31 = vmul.f32 0.0078125, %v86_v28  ;;  %v146_v34 = vmul.f32 %v1508_v26, %v1508_v26  ;;  %v1176_v28 = vld [vmem:[#allocation5 + $0x54] ss:$8 sps:$4 sm:$0xff]  }
  0xcc   :  { %v1512_v32 = vsub.f32 %v64_v2, %v113_v29  ;;  %160 = vadd.xlane.f32.xlu0 %v144_v30  ;;  %v1514_v33 = vsub.f32 %v66_v3, %v115_v31  ;;  %v1178_v29 = vld [vmem:[#allocation5 + $0x50] ss:$8 sps:$4 sm:$0xff]   ;;  %v1179_v31 = vld [vmem:[#allocation5 + $0x64] ss:$8 sps:$4 sm:$0xff]  }
  0xcd   :  { %v88_v35 = vpop.xlane.xlu0 %87  ;;  %v90_v36 = vpop.xlane.xlu1 %89 }
  0xce   :  { %v116_v37 = vmul.f32 0.0078125, %v88_v35  ;;  %v145_v38 = vmul.f32 %v1512_v32, %v1512_v32  ;;  %v117_v39 = vmul.f32 0.0078125, %v90_v36  ;;  %v147_v42 = vmul.f32 %v1514_v33, %v1514_v33  ;;  %v1184_v35 = vld [vmem:[#allocation5 + $0x70] ss:$8 sps:$4 sm:$0xff]  }
  0xcf   :  { %v1398_v36 = vmov 0  }
  0xd0   :  { %v1520_v40 = vsub.f32 %v67_v4, %v116_v37  ;;  %164 = vadd.xlane.f32.xlu0 %v146_v34  ;;  %162 = vadd.xlane.f32.xlu1 %v145_v38  ;;  %v1522_v41 = vsub.f32 %v68_v5, %v117_v39  ;;  %v1181_v34 = vld [vmem:[#allocation5 + $0x60] ss:$8 sps:$4 sm:$0xff]  }
  0xd1   :  { %v92_v43 = vpop.xlane.xlu0 %91  ;;  %v94_v44 = vpop.xlane.xlu1 %93  ;;  %404 = vmatprep.mubr.bf16.mxu0 %v1398_v36 }
  0xd2   :  { %v118_v45 = vmul.f32 0.0078125, %v92_v43  ;;  %v148_v46 = vmul.f32 %v1520_v40, %v1520_v40  ;;  %v119_v47 = vmul.f32 0.0078125, %v94_v44  ;;  %v149_v50 = vmul.f32 %v1522_v41, %v1522_v41 }
  0xd4   :  { %v1528_v48 = vsub.f32 %v69_v6, %v118_v45  ;;  %166 = vadd.xlane.f32.xlu1 %v147_v42  ;;  %168 = vadd.xlane.f32.xlu0 %v148_v46  ;;  %v1531_v49 = vsub.f32 %v1479_v7, %v119_v47  ;;  %v1172_v7 = vld [vmem:[#allocation5 + $0x30] ss:$8 sps:$4 sm:$0xff]  }
  0xd5   :  { %v96_v51 = vpop.xlane.xlu0 %95  ;;  %v98_v52 = vpop.xlane.xlu1 %97  ;;  %379 = vmatpush1.bf16.msra.mxu0 %v1172_v7 }
  0xd6   :  { %v120_v53 = vmul.f32 0.0078125, %v96_v51  ;;  %v150_v54 = vmul.f32 %v1528_v48, %v1528_v48  ;;  %v121_v55 = vmul.f32 0.0078125, %v98_v52  ;;  %v151_v58 = vmul.f32 %v1531_v49, %v1531_v49  ;;  %380 = vmatprep.subr.bf16.mxu0 %v1173_v18 }
  0xd8   :  { %v1538_v56 = vsub.f32 %v1481_v8, %v120_v53  ;;  %170 = vadd.xlane.f32.xlu1 %v149_v50  ;;  %172 = vadd.xlane.f32.xlu0 %v150_v54  ;;  %v1541_v57 = vsub.f32 %v1483_v9, %v121_v55 }
  0xd9   :  { %v100_v60 = vpop.xlane.xlu0 %99  ;;  %v102_v61 = vpop.xlane.xlu1 %101  ;;  %381 = vmatpush1.bf16.msra.mxu0 %v1175_v21 }
  0xda   :  { %v122_v62 = vmul.f32 0.0078125, %v100_v60  ;;  %v152_v63 = vmul.f32 %v1538_v56, %v1538_v56  ;;  %v123_v0 = vmul.f32 0.0078125, %v102_v61  ;;  %v153_v4 = vmul.f32 %v1541_v57, %v1541_v57  ;;  %382 = vmatprep.subr.bf16.mxu0 %v1176_v28 }
  0xdc   :  { %v1548_v2 = vsub.f32 %v1486_v10, %v122_v62  ;;  %174 = vadd.xlane.f32.xlu1 %v151_v58  ;;  %176 = vadd.xlane.f32.xlu0 %v152_v63  ;;  %v1551_v3 = vsub.f32 %v1488_v11, %v123_v0 }
  0xdd   :  { %v104_v5 = vpop.xlane.xlu0 %103  ;;  %v106_v6 = vpop.xlane.xlu1 %105  ;;  %383 = vmatpush1.bf16.msra.mxu0 %v1178_v29 }
  0xde   :  { %v124_v8 = vmul.f32 0.0078125, %v104_v5  ;;  %v154_v9 = vmul.f32 %v1548_v2, %v1548_v2  ;;  %v125_v16 = vmul.f32 0.0078125, %v106_v6  ;;  %v155_v17 = vmul.f32 %v1551_v3, %v1551_v3  ;;  %384 = vmatprep.subr.bf16.mxu0 %v1179_v31 }
  0xe0   :  { %v1558_v10 = vsub.f32 %v1494_v12, %v124_v8  ;;  %178 = vadd.xlane.f32.xlu1 %v153_v4  ;;  %180 = vadd.xlane.f32.xlu0 %v154_v9  ;;  %v1561_v11 = vsub.f32 %v1496_v13, %v125_v16 }
  0xe1   :  { %v108_v19 = vpop.xlane.xlu0 %107  ;;  %v110_v20 = vpop.xlane.xlu1 %109  ;;  %385 = vmatpush1.bf16.msra.mxu0 %v1181_v34 }
  0xe2   :  { %v126_v22 = vmul.f32 0.0078125, %v108_v19  ;;  %v156_v23 = vmul.f32 %v1558_v10, %v1558_v10  ;;  %v127_v24 = vmul.f32 0.0078125, %v110_v20  ;;  %v157_v27 = vmul.f32 %v1561_v11, %v1561_v11 }
  0xe4   :  { %v1568_v12 = vsub.f32 %v1500_v14, %v126_v22  ;;  %182 = vadd.xlane.f32.xlu1 %v155_v17  ;;  %184 = vadd.xlane.f32.xlu0 %v156_v23  ;;  %v1571_v13 = vsub.f32 %v1502_v15, %v127_v24  ;;  %v1182_v15 = vld [vmem:[#allocation5 + $0x74] ss:$8 sps:$4 sm:$0xff]  }
  0xe5   :  { %386 = vmatprep.subr.bf16.mxu0 %v1182_v15 }
  0xe6   :  { %v158_v30 = vmul.f32 %v1568_v12, %v1568_v12  ;;  %v159_v14 = vmul.f32 %v1571_v13, %v1571_v13  ;;  %387 = vmatpush1.bf16.msra.mxu0 %v1184_v35 }
  0xe8   :  { %186 = vadd.xlane.f32.xlu1 %v157_v27  ;;  %188 = vadd.xlane.f32.xlu0 %v158_v30 }
  0xec   :  { %190 = vadd.xlane.f32.xlu1 %v159_v14 }
 0x159   :  { %v161_v37 = vpop.xlane.xlu0 %160 }
 0x15a   :  { %v192_v38 = vmul.f32 0.0078125, %v161_v37 }
 0x15c   :  { %v208_v39 = vadd.f32 1e-05, %v192_v38 }
 0x15d   :  { %v163_v42 = vpop.xlane.xlu1 %162  ;;  %v165_v43 = vpop.xlane.xlu0 %164 }
 0x15e   :  { %v193_v44 = vmul.f32 0.0078125, %v163_v42  ;;  %1201 = vrsqrt.f32 %v208_v39  ;;  %v194_v46 = vmul.f32 0.0078125, %v165_v43 }
 0x160   :  { %v209_v45 = vadd.f32 1e-05, %v193_v44  ;;  %v210_v51 = vadd.f32 1e-05, %v194_v46 }
 0x161   :  { %v167_v47 = vpop.xlane.xlu1 %166  ;;  %v169_v53 = vpop.xlane.xlu0 %168 }
 0x162   :  { %1203 = vrsqrt.f32 %v209_v45  ;;  %v195_v50 = vmul.f32 0.0078125, %v167_v47  ;;  %v196_v58 = vmul.f32 0.0078125, %v169_v53 }
 0x164   :  { %v211_v52 = vadd.f32 1e-05, %v195_v50  ;;  %v212_v63 = vadd.f32 1e-05, %v196_v58 }
 0x165   :  { %v171_v54 = vpop.xlane.xlu1 %170  ;;  %v173_v0 = vpop.xlane.xlu0 %172 }
 0x166   :  { %1205 = vrsqrt.f32 %v211_v52  ;;  %v197_v55 = vmul.f32 0.0078125, %v171_v54  ;;  %v198_v8 = vmul.f32 0.0078125, %v173_v0 }
 0x167   :  { %1207 = vrsqrt.f32 %v210_v51 }
 0x168   :  { %v1202_v59 = vpop.eup %1201  ;;  %v213_v60 = vadd.f32 1e-05, %v197_v55  ;;  %v214_v19 = vadd.f32 1e-05, %v198_v8 }
 0x169   :  { %v175_v61 = vpop.xlane.xlu1 %174  ;;  %v240_v1 = vmul.f32 %v1202_v59, %v1506_v25  ;;  %v177_v20 = vpop.xlane.xlu0 %176 }
 0x16a   :  { %1209 = vrsqrt.f32 %v213_v60  ;;  %v199_v5 = vmul.f32 0.0078125, %v175_v61  ;;  %v200_v23 = vmul.f32 0.0078125, %v177_v20  ;;  %v1191_v20 = vld [vmem:[#allocation7 + $0x58] sm:$0xff]  }
 0x16b   :  { %1211 = vrsqrt.f32 %v212_v63 }
 0x16c   :  { %v1204_v62 = vpop.eup %1203  ;;  %v215_v16 = vadd.f32 1e-05, %v199_v5  ;;  %v216_v30 = vadd.f32 1e-05, %v200_v23  ;;  %v1199_v23 = vld [vmem:[#allocation7 + $0x78] sm:$0xff]  }
 0x16d   :  { %v241_v4 = vmul.f32 %v1204_v62, %v1512_v32  ;;  %v179_v17 = vpop.xlane.xlu1 %178 }
 0x16e   :  { %1213 = vrsqrt.f32 %v215_v16  ;;  %v201_v32 = vmul.f32 0.0078125, %v179_v17  ;;  %v1185_v16 = vld [vmem:[#allocation7 + $0x40] sm:$0xff]  }
 0x16f   :  { %v256_v6 = vpack.c.bf16 %v241_v4, %v240_v1  ;;  %1215 = vrsqrt.f32 %v214_v19  ;;  %v1186_v17 = vld [vmem:[#allocation7] sm:$0xff]   ;;  %1088 = vmatprep.subr.bf16.mxu1 %v1185_v16  ;;  %v1190_v19 = vld [vmem:[#allocation7 + $0x10] sm:$0xff]  }
 0x170   :  { %v1206_v7 = vpop.eup %1205  ;;  %v217_v27 = vadd.f32 1e-05, %v201_v32  ;;  %1089 = vmatpush3.bf16.msra.mxu1 %v1186_v17  ;;  %v1196_v32 = vld [vmem:[#allocation7 + $0x28] sm:$0xff]  }
 0x171   :  { %405 = vmatmul.mubr.bf16.vlgmr.msra.gmra.mrb[0].mxu0 %v256_v6  ;;  %v1208_v9 = vpop.eup %1207  ;;  %v243_v18 = vmul.f32 %v1206_v7, %v1514_v33  ;;  %v183_v28 = vpop.xlane.xlu1 %182 }
 0x172   :  { %414 = vmatprep.mubr.bf16.mxu0 %v1398_v36  ;;  %v242_v25 = vmul.f32 %v1208_v9, %v1508_v26  ;;  %v181_v33 = vpop.xlane.xlu0 %180  ;;  %1217 = vrsqrt.f32 %v217_v27  ;;  %v203_v26 = vmul.f32 0.0078125, %v183_v28  ;;  %v282_v27 = vlaneseq }
 0x173   :  { %1219 = vrsqrt.f32 %v216_v30  ;;  %v202_v15 = vmul.f32 0.0078125, %v181_v33  ;;  %v280_v30 = vld [vmem:[%s1907_s2] sm:$0x3] }
 0x174   :  { %v257_v21 = vpack.c.bf16 %v243_v18, %v242_v25  ;;  %v1210_v22 = vpop.eup %1209  ;;  %v219_v37 = vadd.f32 1e-05, %v203_v26  ;;  %v1187_v18 = vld [vmem:[#allocation7 + $0x48] sm:$0xff]   ;;  %v283_v28 = vshrl.u32 %v282_v27, 7 }
 0x175   :  { %v1212_v24 = vpop.eup %1211  ;;  %v245_v29 = vmul.f32 %v1210_v22, %v1522_v41  ;;  %v187_v38 = vpop.xlane.xlu1 %186  ;;  %v218_v42 = vadd.f32 1e-05, %v202_v15  ;;  %1090 = vmatprep.subr.bf16.mxu1 %v1187_v18  ;;  %v1195_v25 = vld [vmem:[#allocation7 + $0x68] sm:$0xff]   ;;  %v1198_v22 = vld [vmem:[#allocation7 + $0x30] sm:$0xff]  }
 0x176   :  { %v244_v14 = vmul.f32 %v1212_v24, %v1520_v40  ;;  %v185_v41 = vpop.xlane.xlu0 %184  ;;  %1221 = vrsqrt.f32 %v219_v37  ;;  %v205_v40 = vmul.f32 0.0078125, %v187_v38  ;;  %v1200_v24 = vld [vmem:[#allocation7 + $0x38] sm:$0xff]   ;;  %v288_v33 = vsub.s32 1, %v283_v28 }
 0x177   :  { %1223 = vrsqrt.f32 %v218_v42  ;;  %v204_v46 = vmul.f32 0.0078125, %v185_v41 }
 0x178   :  { %v258_v31 = vpack.c.bf16 %v245_v29, %v244_v14  ;;  %v1214_v34 = vpop.eup %1213  ;;  %v221_v50 = vadd.f32 1e-05, %v205_v40  ;;  %v284_v29 = vsub.s32 0, %v283_v28  ;;  %v1608_v26 = vrot.slane %v280_v30, %v288_v33 }
 0x179   :  { %415 = vmatmul.mubr.bf16.gmra.mrb[4].mxu0 %v257_v21  ;;  %v1216_v35 = vpop.eup %1215  ;;  %v247_v39 = vmul.f32 %v1214_v34, %v1531_v49  ;;  %v191_v51 = vpop.xlane.xlu1 %190  ;;  %v220_v53 = vadd.f32 1e-05, %v204_v46  ;;  %v1197_v21 = vld [vmem:[#allocation7 + $0x70] sm:$0xff]  }
 0x17a   :  { %424 = vmatprep.mubr.bf16.mxu0 %v1398_v36  ;;  %v246_v43 = vmul.f32 %v1216_v35, %v1528_v48  ;;  %v189_v49 = vpop.xlane.xlu0 %188  ;;  %1225 = vrsqrt.f32 %v221_v50  ;;  %v207_v48 = vmul.f32 0.0078125, %v191_v51  ;;  %v1606_v14 = vrot.slane %v280_v30, %v284_v29 }
 0x17b   :  { %1227 = vrsqrt.f32 %v220_v53  ;;  %v206_v59 = vmul.f32 0.0078125, %v189_v49 }
 0x17c   :  { %v259_v44 = vpack.c.bf16 %v247_v39, %v246_v43  ;;  %v1218_v45 = vpop.eup %1217  ;;  %v223_v61 = vadd.f32 1e-05, %v207_v48 }
 0x17d   :  { %v1220_v47 = vpop.eup %1219  ;;  %v249_v52 = vmul.f32 %v1218_v45, %v1541_v57  ;;  %v222_v63 = vadd.f32 1e-05, %v206_v59 }
 0x17e   :  { %v248_v54 = vmul.f32 %v1220_v47, %v1538_v56  ;;  %1229 = vrsqrt.f32 %v223_v61 }
 0x17f   :  { %1231 = vrsqrt.f32 %v222_v63 }
 0x180   :  { %v260_v55 = vpack.c.bf16 %v249_v52, %v248_v54  ;;  %v1222_v58 = vpop.eup %1221 }
 0x181   :  { %425 = vmatmul.mubr.bf16.gmra.mrb[8].mxu0 %v258_v31  ;;  %v1224_v60 = vpop.eup %1223  ;;  %v251_v62 = vmul.f32 %v1222_v58, %v1551_v3 }
 0x182   :  { %434 = vmatprep.mubr.bf16.mxu0 %v1398_v36  ;;  %v250_v57 = vmul.f32 %v1224_v60, %v1548_v2 }
 0x184   :  { %v261_v0 = vpack.c.bf16 %v251_v62, %v250_v57  ;;  %v1226_v1 = vpop.eup %1225 }
 0x185   :  { %v1228_v56 = vpop.eup %1227  ;;  %v253_v4 = vmul.f32 %v1226_v1, %v1561_v11  ;;  %v1188_v11 = vld [vmem:[#allocation7 + $0x8] sm:$0xff]  }
 0x186   :  { %v252_v5 = vmul.f32 %v1228_v56, %v1558_v10  ;;  %1091 = vmatpush3.bf16.msra.mxu1 %v1188_v11  ;;  %v1189_v10 = vld [vmem:[#allocation7 + $0x50] sm:$0xff]  }
 0x187   :  { %1092 = vmatprep.subr.bf16.mxu1 %v1189_v10 }
 0x188   :  { %v262_v6 = vpack.c.bf16 %v253_v4, %v252_v5  ;;  %v1230_v7 = vpop.eup %1229 }
 0x189   :  { %435 = vmatmul.mubr.bf16.gmra.mrb[12].mxu0 %v259_v44  ;;  %v1232_v8 = vpop.eup %1231  ;;  %v255_v2 = vmul.f32 %v1230_v7, %v1571_v13  ;;  %v1193_v13 = vld [vmem:[#allocation7 + $0x60] sm:$0xff]  }
 0x18a   :  { %444 = vmatprep.mubr.bf16.mxu0 %v1398_v36  ;;  %v254_v3 = vmul.f32 %v1232_v8, %v1568_v12  ;;  %1093 = vmatpush3.bf16.msra.mxu1 %v1190_v19  ;;  %v1194_v12 = vld [vmem:[#allocation7 + $0x20] sm:$0xff]  }
 0x18b   :  { %1094 = vmatprep.subr.bf16.mxu1 %v1191_v20 }
 0x18c   :  { %v263_v9 = vpack.c.bf16 %v255_v2, %v254_v3 }
 0x191   :  { %445 = vmatmul.mubr.bf16.gmra.mrb[16].mxu0 %v260_v55 }
 0x192   :  { %454 = vmatprep.mubr.bf16.mxu0 %v1398_v36 }
 0x199   :  { %455 = vmatmul.mubr.bf16.gmra.mrb[20].mxu0 %v261_v0 }
 0x19a   :  { %464 = vmatprep.mubr.bf16.mxu0 %v1398_v36 }
 0x1a1   :  { %465 = vmatmul.mubr.bf16.gmra.mrb[24].mxu0 %v262_v6 }
 0x1a2   :  { %474 = vmatprep.mubr.bf16.mxu0 %v1398_v36  ;;  %v1192_v36 = vld [vmem:[#allocation7 + $0x18] sm:$0xff]  }
 0x1a3   :  { %1095 = vmatpush3.bf16.msra.mxu1 %v1192_v36 }
 0x1a4   :  { %1096 = vmatprep.subr.bf16.mxu1 %v1193_v13 }
 0x1a7   :  { %1097 = vmatpush3.bf16.msra.mxu1 %v1194_v12 }
 0x1a8   :  { %1098 = vmatprep.subr.bf16.mxu1 %v1195_v25 }
 0x1a9   :  { %475 = vmatmul.mubr.bf16.gmra.mrb[28].mxu0 %v263_v9 }
 0x1ab   :  { %1099 = vmatpush3.bf16.msra.mxu1 %v1196_v32 }
 0x1ac   :  { %1100 = vmatprep.subr.bf16.mxu1 %v1197_v21 }
 0x1af   :  { %1101 = vmatpush3.bf16.msra.mxu1 %v1198_v22 }
 0x1b0   :  { %1102 = vmatprep.subr.bf16.mxu1 %v1199_v23 }
 0x1b3   :  { %1103 = vmatpush3.bf16.msra.mxu1 %v1200_v24 }
 0x244   :  { %v406_v31 = vpop.f32.mrb[0].mxu0 }
 0x245   :  { %v407_v34 = vadd.f32 %v406_v31, %v1606_v14  ;;  %v408_v15 = vpop.f32.mrb[1].mxu0 }
 0x246   :  { %v1612_v35 = vadd.f32 %v408_v15, %v1608_v26  ;;  %v410_v37 = vpop.f32.mrb[2].mxu0 }
 0x247   :  { %v517_v38 = vmul.f32 0.044715, %v407_v34  ;;  %v1615_v39 = vadd.f32 %v410_v37, %v1606_v14  ;;  %v412_v42 = vpop.f32.mrb[3].mxu0  ;;  %v485_v24 = vmul.f32 0.5, %v407_v34 }
 0x248   :  { %v518_v41 = vmul.f32 0.044715, %v1612_v35  ;;  %v1619_v43 = vadd.f32 %v412_v42, %v1608_v26  ;;  %v486_v15 = vmul.f32 0.5, %v1612_v35 }
 0x249   :  { %v549_v40 = vmul.f32 %v517_v38, %v407_v34  ;;  %v519_v44 = vmul.f32 0.044715, %v1615_v39 }
 0x24a   :  { %v520_v45 = vmul.f32 0.044715, %v1619_v43  ;;  %v550_v46 = vmul.f32 %v518_v41, %v1612_v35 }
 0x24b   :  { %v581_v47 = vmul.f32 %v549_v40, %v407_v34  ;;  %v551_v50 = vmul.f32 %v519_v44, %v1615_v39 }
 0x24c   :  { %v416_v51 = vpop.f32.mrb[4].mxu0  ;;  %v552_v52 = vmul.f32 %v520_v45, %v1619_v43  ;;  %v582_v53 = vmul.f32 %v550_v46, %v1612_v35  ;;  %v488_v45 = vmul.f32 0.5, %v1619_v43  ;;  %v487_v46 = vmul.f32 0.5, %v1615_v39 }
 0x24d   :  { %v583_v49 = vmul.f32 %v551_v50, %v1615_v39  ;;  %v1629_v54 = vadd.f32 %v416_v51, %v1606_v14  ;;  %v418_v48 = vpop.f32.mrb[5].mxu0  ;;  %v613_v55 = vadd.f32 %v581_v47, %v407_v34 }
 0x24e   :  { %v419_v58 = vadd.f32 %v418_v48, %v1608_v26  ;;  %v420_v59 = vpop.f32.mrb[6].mxu0  ;;  %v584_v60 = vmul.f32 %v552_v52, %v1619_v43  ;;  %v614_v61 = vadd.f32 %v582_v53, %v1612_v35 }
 0x24f   :  { %v521_v62 = vmul.f32 0.044715, %v1629_v54  ;;  %v1636_v63 = vadd.f32 %v420_v59, %v1606_v14  ;;  %v422_v57 = vpop.f32.mrb[7].mxu0  ;;  %v615_v0 = vadd.f32 %v583_v49, %v1615_v39  ;;  %v645_v1 = vmul.f32 0.7978846, %v613_v55 }
 0x250   :  { %v522_v56 = vmul.f32 0.044715, %v419_v58  ;;  %v423_v4 = vadd.f32 %v422_v57, %v1608_v26  ;;  %v616_v5 = vadd.f32 %v584_v60, %v1619_v43  ;;  %v646_v6 = vmul.f32 0.7978846, %v614_v61 }
 0x251   :  { %v553_v7 = vmul.f32 %v521_v62, %v1629_v54  ;;  %v523_v8 = vmul.f32 0.044715, %v1636_v63  ;;  %v647_v2 = vmul.f32 0.7978846, %v615_v0  ;;  %1233 = vtanh.f32 %v645_v1 }
 0x252   :  { %v554_v3 = vmul.f32 %v522_v56, %v419_v58  ;;  %v524_v9 = vmul.f32 0.044715, %v423_v4  ;;  %v648_v16 = vmul.f32 0.7978846, %v616_v5  ;;  %1235 = vtanh.f32 %v646_v6 }
 0x253   :  { %v585_v17 = vmul.f32 %v553_v7, %v1629_v54  ;;  %v555_v18 = vmul.f32 %v523_v8, %v1636_v63  ;;  %1237 = vtanh.f32 %v647_v2  ;;  %v1668_v52 = vmul.f32 0.5, %v419_v58 }
 0x254   :  { %v586_v11 = vmul.f32 %v554_v3, %v419_v58  ;;  %v556_v10 = vmul.f32 %v524_v9, %v423_v4  ;;  %v426_v19 = vpop.f32.mrb[8].mxu0  ;;  %1239 = vtanh.f32 %v648_v16  ;;  %v492_v59 = vmul.f32 0.5, %v423_v4 }
 0x255   :  { %v587_v20 = vmul.f32 %v555_v18, %v1636_v63  ;;  %v428_v36 = vpop.f32.mrb[9].mxu0  ;;  %v617_v21 = vadd.f32 %v585_v17, %v1629_v54  ;;  %v1651_v22 = vadd.f32 %v426_v19, %v1606_v14  ;;  %v491_v9 = vmul.f32 0.5, %v1636_v63 }
 0x256   :  { %v588_v13 = vmul.f32 %v556_v10, %v423_v4  ;;  %v1647_v12 = vadd.f32 %v428_v36, %v1608_v26  ;;  %v430_v25 = vpop.f32.mrb[10].mxu0  ;;  %v618_v32 = vadd.f32 %v586_v11, %v419_v58 }
 0x257   :  { %v432_v23 = vpop.f32.mrb[11].mxu0  ;;  %v619_v27 = vadd.f32 %v587_v20, %v1636_v63  ;;  %v1659_v31 = vadd.f32 %v430_v25, %v1606_v14  ;;  %v649_v37 = vmul.f32 0.7978846, %v617_v21  ;;  %v525_v44 = vmul.f32 0.044715, %v1651_v22 }
 0x258   :  { %v526_v28 = vmul.f32 0.044715, %v1647_v12  ;;  %v1656_v29 = vadd.f32 %v432_v23, %v1608_v26  ;;  %v620_v30 = vadd.f32 %v588_v13, %v423_v4  ;;  %v650_v33 = vmul.f32 0.7978846, %v618_v32 }
 0x259   :  { %v651_v38 = vmul.f32 0.7978846, %v619_v27  ;;  %v527_v43 = vmul.f32 0.044715, %v1659_v31  ;;  %v557_v58 = vmul.f32 %v525_v44, %v1651_v22  ;;  %v489_v4 = vmul.f32 0.5, %v1629_v54 }
 0x25a   :  { %v558_v42 = vmul.f32 %v526_v28, %v1647_v12  ;;  %v528_v34 = vmul.f32 0.044715, %v1656_v29  ;;  %v652_v41 = vmul.f32 0.7978846, %v620_v30  ;;  %1241 = vtanh.f32 %v650_v33 }
 0x25b   :  { %v1234_v40 = vpop.eup %1233  ;;  %1243 = vtanh.f32 %v649_v37  ;;  %v559_v17 = vmul.f32 %v527_v43, %v1659_v31  ;;  %v1690_v54 = vmul.f32 0.5, %v1651_v22  ;;  %v589_v25 = vmul.f32 %v557_v58, %v1651_v22 }
 0x25c   :  { %v1236_v47 = vpop.eup %1235  ;;  %v560_v50 = vmul.f32 %v528_v34, %v1656_v29  ;;  %v436_v35 = vpop.f32.mrb[12].mxu0  ;;  %v709_v51 = vadd.f32 1.0, %v1234_v40  ;;  %1245 = vtanh.f32 %v652_v41  ;;  %v590_v49 = vmul.f32 %v558_v42, %v1647_v12 }
 0x25d   :  { %v1238_v53 = vpop.eup %1237  ;;  %v438_v48 = vpop.f32.mrb[13].mxu0  ;;  %v710_v55 = vadd.f32 1.0, %v1236_v47  ;;  %1247 = vtanh.f32 %v651_v38  ;;  %v1678_v0 = vadd.f32 %v436_v35, %v1606_v14  ;;  %v1703_v33 = vmul.f32 0.5, %v1647_v12 }
 0x25e   :  { %v1240_v60 = vpop.eup %1239  ;;  %v592_v39 = vmul.f32 %v560_v50, %v1656_v29  ;;  %v1674_v61 = vadd.f32 %v438_v48, %v1608_v26  ;;  %v440_v62 = vpop.f32.mrb[14].mxu0  ;;  %v711_v57 = vadd.f32 1.0, %v1238_v53  ;;  %v741_v7 = vmul.f32 %v709_v51, %v485_v24 }
 0x25f   :  { %v442_v1 = vpop.f32.mrb[15].mxu0  ;;  %v712_v56 = vadd.f32 1.0, %v1240_v60  ;;  %v742_v2 = vmul.f32 %v710_v55, %v486_v15  ;;  %v622_v16 = vadd.f32 %v590_v49, %v1647_v12  ;;  %v529_v10 = vmul.f32 0.044715, %v1678_v0 }
 0x260   :  { %v530_v5 = vmul.f32 0.044715, %v1674_v61  ;;  %v1683_v6 = vadd.f32 %v442_v1, %v1608_v26  ;;  %v743_v8 = vmul.f32 %v711_v57, %v487_v46  ;;  %v624_v11 = vadd.f32 %v592_v39, %v1656_v29 }
 0x261   :  { %v744_v3 = vmul.f32 %v712_v56, %v488_v45  ;;  %v654_v36 = vmul.f32 0.7978846, %v622_v16  ;;  %v1697_v32 = vadd.f32 %v440_v62, %v1606_v14  ;;  %v591_v37 = vmul.f32 %v559_v17, %v1659_v31 }
 0x262   :  { %v773_v18 = vpack.c.bf16 %v743_v8, %v741_v7  ;;  %v532_v19 = vmul.f32 0.044715, %v1683_v6  ;;  %v562_v63 = vmul.f32 %v530_v5, %v1674_v61  ;;  %v656_v23 = vmul.f32 0.7978846, %v624_v11 }
 0x263   :  { %v774_v20 = vpack.c.bf16 %v744_v3, %v742_v2  ;;  %1249 = vtanh.f32 %v654_v36  ;;  %v561_v40 = vmul.f32 %v529_v10, %v1678_v0  ;;  %v531_v50 = vmul.f32 0.044715, %v1697_v32 }
 0x264   :  { %v1242_v13 = vpop.eup %1241  ;;  %v446_v21 = vpop.f32.mrb[16].mxu0  ;;  %1251 = vtanh.f32 %v656_v23  ;;  %v564_v44 = vmul.f32 %v532_v19, %v1683_v6  ;;  %v594_v47 = vmul.f32 %v562_v63, %v1674_v61  ;;  %v621_v55 = vadd.f32 %v589_v25, %v1651_v22 }
 0x265   :  { %v1244_v24 = vpop.eup %1243  ;;  %v1700_v27 = vadd.f32 %v446_v21, %v1606_v14  ;;  %v448_v28 = vpop.f32.mrb[17].mxu0  ;;  %956 = vmatprep.mubr.bf16.mxu1 %v774_v20  ;;  %v714_v30 = vadd.f32 1.0, %v1242_v13  ;;  %v623_v62 = vadd.f32 %v591_v37, %v1659_v31  ;;  %v563_v5 = vmul.f32 %v531_v50, %v1697_v32 }
 0x266   :  { %v1246_v15 = vpop.eup %1245  ;;  %v1707_v38 = vadd.f32 %v448_v28, %v1608_v26  ;;  %v450_v42 = vpop.f32.mrb[18].mxu0  ;;  %957 = vmatmul.mubr.bf16.vlgmr.msra.gmra.mrb[0].mxu1 %v773_v18  ;;  %v713_v34 = vadd.f32 1.0, %v1244_v24  ;;  %v596_v57 = vmul.f32 %v564_v44, %v1683_v6  ;;  %v653_v56 = vmul.f32 0.7978846, %v621_v55 }
 0x267   :  { %v1248_v41 = vpop.eup %1247  ;;  %v1712_v45 = vadd.f32 %v450_v42, %v1606_v14  ;;  %v452_v12 = vpop.f32.mrb[19].mxu0  ;;  %v716_v46 = vadd.f32 1.0, %v1246_v15  ;;  %v533_v35 = vmul.f32 0.044715, %v1700_v27  ;;  %v746_v49 = vmul.f32 %v714_v30, %v1668_v52 }
 0x268   :  { %v715_v51 = vadd.f32 1.0, %v1248_v41  ;;  %v534_v53 = vmul.f32 0.044715, %v1707_v38  ;;  %v1721_v60 = vadd.f32 %v452_v12, %v1608_v26  ;;  %v745_v43 = vmul.f32 %v713_v34, %v489_v4 }
 0x269   :  { %v748_v48 = vmul.f32 %v716_v46, %v492_v59  ;;  %v535_v58 = vmul.f32 0.044715, %v1712_v45  ;;  %v496_v59 = vmul.f32 0.5, %v1656_v29  ;;  %v655_v22 = vmul.f32 0.7978846, %v623_v62 }
 0x26a   :  { %v747_v39 = vmul.f32 %v715_v51, %v491_v9  ;;  %v593_v8 = vmul.f32 %v561_v40, %v1678_v0  ;;  %v565_v4 = vmul.f32 %v533_v35, %v1700_v27  ;;  %1253 = vtanh.f32 %v653_v56 }
 0x26b   :  { %v776_v1 = vpack.c.bf16 %v748_v48, %v746_v49  ;;  %v566_v9 = vmul.f32 %v534_v53, %v1707_v38  ;;  %v536_v16 = vmul.f32 0.044715, %v1721_v60  ;;  %1255 = vtanh.f32 %v655_v22 }
 0x26c   :  { %v456_v7 = vpop.f32.mrb[20].mxu0  ;;  %v775_v52 = vpack.c.bf16 %v747_v39, %v745_v43  ;;  %v567_v11 = vmul.f32 %v535_v58, %v1712_v45  ;;  %v495_v19 = vmul.f32 0.5, %v1659_v31  ;;  %v626_v20 = vadd.f32 %v594_v47, %v1674_v61 }
 0x26d   :  { %v1731_v2 = vadd.f32 %v456_v7, %v1606_v14  ;;  %v458_v3 = vpop.f32.mrb[21].mxu0  ;;  %964 = vmatprep.mubr.bf16.mxu1 %v776_v1  ;;  %v1250_v29 = vpop.eup %1249  ;;  %v628_v36 = vadd.f32 %v596_v57, %v1683_v6  ;;  %v595_v25 = vmul.f32 %v563_v5, %v1697_v32  ;;  %v1750_v24 = vmul.f32 %v565_v4, %v1700_v27 }
 0x26e   :  { %v1736_v17 = vadd.f32 %v458_v3, %v1608_v26  ;;  %v460_v18 = vpop.f32.mrb[22].mxu0  ;;  %965 = vmatmul.mubr.bf16.gmra.mrb[4].mxu1 %v775_v52  ;;  %v1252_v13 = vpop.eup %1251  ;;  %v718_v23 = vadd.f32 1.0, %v1250_v29  ;;  %v658_v30 = vmul.f32 0.7978846, %v626_v20  ;;  %v598_v15 = vmul.f32 %v566_v9, %v1707_v38 }
 0x26f   :  { %v462_v10 = vpop.f32.mrb[23].mxu0  ;;  %v1744_v63 = vadd.f32 %v460_v18, %v1606_v14  ;;  %v537_v28 = vmul.f32 0.044715, %v1731_v2  ;;  %v720_v31 = vadd.f32 1.0, %v1252_v13  ;;  %v568_v37 = vmul.f32 %v536_v16, %v1721_v60 }
 0x270   :  { %v1747_v21 = vadd.f32 %v462_v10, %v1608_v26  ;;  %v538_v42 = vmul.f32 0.044715, %v1736_v17  ;;  %v660_v34 = vmul.f32 0.7978846, %v628_v36  ;;  %v1757_v41 = vmul.f32 %v567_v11, %v1712_v45 }
 0x271   :  { %v750_v40 = vmul.f32 %v718_v23, %v1703_v33  ;;  %v752_v44 = vmul.f32 %v720_v31, %v496_v59  ;;  %1257 = vtanh.f32 %v658_v30  ;;  %v539_v12 = vmul.f32 0.044715, %v1744_v63 }
 0x272   :  { %v540_v46 = vmul.f32 0.044715, %v1747_v21  ;;  %v1763_v50 = vmul.f32 0.5, %v1674_v61  ;;  %1259 = vtanh.f32 %v660_v34  ;;  %v569_v35 = vmul.f32 %v537_v28, %v1731_v2 }
 0x273   :  { %v778_v49 = vpack.c.bf16 %v752_v44, %v750_v40  ;;  %v625_v33 = vadd.f32 %v593_v8, %v1678_v0  ;;  %v600_v48 = vmul.f32 %v568_v37, %v1721_v60  ;;  %v570_v55 = vmul.f32 %v538_v42, %v1736_v17 }
 0x274   :  { %v466_v47 = vpop.f32.mrb[24].mxu0  ;;  %v500_v39 = vmul.f32 0.5, %v1683_v6  ;;  %v627_v61 = vadd.f32 %v595_v25, %v1697_v32  ;;  %v1254_v62 = vpop.eup %1253  ;;  %v1781_v56 = vmul.f32 0.5, %v1678_v0  ;;  %v571_v52 = vmul.f32 %v539_v12, %v1744_v63 }
 0x275   :  { %v1767_v51 = vadd.f32 %v466_v47, %v1606_v14  ;;  %v468_v53 = vpop.f32.mrb[25].mxu0  ;;  %972 = vmatprep.mubr.bf16.mxu1 %v778_v49  ;;  %v657_v5 = vmul.f32 0.7978846, %v625_v33  ;;  %v1256_v7 = vpop.eup %1255  ;;  %v572_v6 = vmul.f32 %v540_v46, %v1747_v21  ;;  %v717_v59 = vadd.f32 1.0, %v1254_v62 }
 0x276   :  { %v470_v43 = vpop.f32.mrb[26].mxu0  ;;  %v1775_v57 = vadd.f32 %v468_v53, %v1608_v26  ;;  %v659_v22 = vmul.f32 0.7978846, %v627_v61  ;;  %v1786_v8 = vmul.f32 %v569_v35, %v1731_v2  ;;  %v719_v4 = vadd.f32 1.0, %v1256_v7 }
 0x277   :  { %v1778_v58 = vadd.f32 %v470_v43, %v1606_v14  ;;  %v472_v1 = vpop.f32.mrb[27].mxu0  ;;  %1261 = vtanh.f32 %v657_v5  ;;  %v602_v9 = vmul.f32 %v570_v55, %v1736_v17  ;;  %v541_v0 = vmul.f32 0.044715, %v1767_v51 }
 0x278   :  { %v1789_v3 = vadd.f32 %v472_v1, %v1608_v26  ;;  %v499_v16 = vmul.f32 0.5, %v1697_v32  ;;  %1263 = vtanh.f32 %v659_v22  ;;  %v542_v18 = vmul.f32 0.044715, %v1775_v57 }
 0x279   :  { %v749_v29 = vmul.f32 %v717_v59, %v1690_v54  ;;  %v751_v11 = vmul.f32 %v719_v4, %v495_v19  ;;  %v630_v10 = vadd.f32 %v598_v15, %v1707_v38  ;;  %v603_v20 = vmul.f32 %v571_v52, %v1744_v63 }
 0x27a   :  { %v604_v36 = vmul.f32 %v572_v6, %v1747_v21  ;;  %v543_v13 = vmul.f32 0.044715, %v1778_v58  ;;  %v632_v23 = vadd.f32 %v600_v48, %v1721_v60  ;;  %v544_v32 = vmul.f32 0.044715, %v1789_v3 }
 0x27b   :  { %v1258_v28 = vpop.eup %1257  ;;  %v777_v31 = vpack.c.bf16 %v751_v11, %v749_v29  ;;  %v662_v19 = vmul.f32 0.7978846, %v630_v10  ;;  %v573_v15 = vmul.f32 %v541_v0, %v1767_v51  ;;  %v574_v12 = vmul.f32 %v542_v18, %v1775_v57 }
 0x27c   :  { %v476_v25 = vpop.f32.mrb[28].mxu0  ;;  %v1260_v37 = vpop.eup %1259  ;;  %v722_v34 = vadd.f32 1.0, %v1258_v28  ;;  %v664_v44 = vmul.f32 0.7978846, %v632_v23  ;;  %v575_v53 = vmul.f32 %v543_v13, %v1778_v58  ;;  %v502_v33 = vmul.f32 0.5, %v1707_v38 }
 0x27d   :  { %v1803_v30 = vadd.f32 %v476_v25, %v1606_v14  ;;  %v478_v54 = vpop.f32.mrb[29].mxu0  ;;  %973 = vmatmul.mubr.bf16.gmra.mrb[8].mxu1 %v777_v31  ;;  %v724_v46 = vadd.f32 1.0, %v1260_v37  ;;  %1265 = vtanh.f32 %v662_v19  ;;  %v576_v48 = vmul.f32 %v544_v32, %v1789_v3 }
 0x27e   :  { %v1807_v42 = vadd.f32 %v478_v54, %v1608_v26  ;;  %v480_v40 = vpop.f32.mrb[30].mxu0  ;;  %1267 = vtanh.f32 %v664_v44  ;;  %v754_v43 = vmul.f32 %v722_v34, %v1763_v50  ;;  %v629_v1 = vadd.f32 %v1750_v24, %v1700_v27 }
 0x27f   :  { %v1811_v47 = vadd.f32 %v480_v40, %v1606_v14  ;;  %v482_v35 = vpop.f32.mrb[31].mxu0  ;;  %v756_v61 = vmul.f32 %v724_v46, %v500_v39  ;;  %v545_v14 = vmul.f32 0.044715, %v1803_v30  ;;  %v605_v38 = vmul.f32 %v573_v15, %v1767_v51 }
 0x280   :  { %v1815_v49 = vadd.f32 %v482_v35, %v1608_v26  ;;  %v546_v55 = vmul.f32 0.044715, %v1807_v42  ;;  %v631_v26 = vadd.f32 %v1757_v41, %v1712_v45  ;;  %v606_v7 = vmul.f32 %v574_v12, %v1775_v57 }
 0x281   :  { %v1262_v5 = vpop.eup %1261  ;;  %v780_v52 = vpack.c.bf16 %v756_v61, %v754_v43  ;;  %v504_v6 = vmul.f32 0.5, %v1721_v60  ;;  %v607_v39 = vmul.f32 %v575_v53, %v1778_v58  ;;  %v547_v59 = vmul.f32 0.044715, %v1811_v47 }
 0x282   :  { %v548_v62 = vmul.f32 0.044715, %v1815_v49  ;;  %v1264_v50 = vpop.eup %1263  ;;  %v721_v22 = vadd.f32 1.0, %v1262_v5  ;;  %v661_v4 = vmul.f32 0.7978846, %v629_v1  ;;  %v578_v24 = vmul.f32 %v546_v55, %v1807_v42 }
 0x283   :  { %980 = vmatprep.mubr.bf16.mxu1 %v780_v52  ;;  %v723_v0 = vadd.f32 1.0, %v1264_v50  ;;  %v663_v18 = vmul.f32 0.7978846, %v631_v26  ;;  %v608_v29 = vmul.f32 %v576_v48, %v1789_v3  ;;  %v577_v11 = vmul.f32 %v545_v14, %v1803_v30 }
 0x284   :  { %v580_v41 = vmul.f32 %v548_v62, %v1815_v49  ;;  %1269 = vtanh.f32 %v661_v4  ;;  %v634_v60 = vadd.f32 %v602_v9, %v1736_v17  ;;  %v753_v10 = vmul.f32 %v721_v22, %v1781_v56 }
 0x285   :  { %v755_v13 = vmul.f32 %v723_v0, %v499_v16  ;;  %1271 = vtanh.f32 %v663_v18  ;;  %v636_v25 = vadd.f32 %v604_v36, %v1747_v21  ;;  %v579_v23 = vmul.f32 %v547_v59, %v1811_v47 }
 0x286   :  { %v666_v28 = vmul.f32 0.7978846, %v634_v60  ;;  %v633_v31 = vadd.f32 %v1786_v8, %v1731_v2  ;;  %v635_v32 = vadd.f32 %v603_v20, %v1744_v63  ;;  %v610_v19 = vmul.f32 %v578_v24, %v1807_v42 }
 0x287   :  { %v1266_v54 = vpop.eup %1265  ;;  %v779_v37 = vpack.c.bf16 %v755_v13, %v753_v10  ;;  %v612_v9 = vmul.f32 %v580_v41, %v1815_v49  ;;  %v668_v15 = vmul.f32 0.7978846, %v636_v25  ;;  %v638_v44 = vadd.f32 %v606_v7, %v1775_v57 }
 0x288   :  { %v1268_v56 = vpop.eup %1267  ;;  %v726_v16 = vadd.f32 1.0, %v1266_v54  ;;  %1273 = vtanh.f32 %v666_v28  ;;  %v665_v34 = vmul.f32 0.7978846, %v633_v31  ;;  %v667_v36 = vmul.f32 0.7978846, %v635_v32 }
 0x289   :  { %981 = vmatmul.mubr.bf16.gmra.mrb[12].mxu1 %v779_v37  ;;  %v728_v40 = vadd.f32 1.0, %v1268_v56  ;;  %1275 = vtanh.f32 %v668_v15  ;;  %v640_v8 = vadd.f32 %v608_v29, %v1789_v3  ;;  %v670_v46 = vmul.f32 0.7978846, %v638_v44 }
 0x28a   :  { %v758_v20 = vmul.f32 %v726_v16, %v502_v33  ;;  %1277 = vtanh.f32 %v665_v34  ;;  %v609_v53 = vmul.f32 %v577_v11, %v1803_v30  ;;  %v611_v48 = vmul.f32 %v579_v23, %v1811_v47 }
 0x28b   :  { %v760_v12 = vmul.f32 %v728_v40, %v504_v6  ;;  %1279 = vtanh.f32 %v667_v36  ;;  %v672_v35 = vmul.f32 0.7978846, %v640_v8  ;;  %v637_v55 = vadd.f32 %v605_v38, %v1767_v51 }
 0x28c   :  { %v639_v43 = vadd.f32 %v607_v39, %v1778_v58  ;;  %1281 = vtanh.f32 %v670_v46  ;;  %v642_v14 = vadd.f32 %v610_v19, %v1807_v42  ;;  %v644_v62 = vadd.f32 %v612_v9, %v1815_v49 }
 0x28d   :  { %v782_v61 = vpack.c.bf16 %v760_v12, %v758_v20  ;;  %v501_v1 = vmul.f32 0.5, %v1700_v27  ;;  %1283 = vtanh.f32 %v672_v35  ;;  %v669_v26 = vmul.f32 0.7978846, %v637_v55 }
 0x28e   :  { %v1270_v33 = vpop.eup %1269  ;;  %v671_v5 = vmul.f32 0.7978846, %v639_v43  ;;  %v503_v52 = vmul.f32 0.5, %v1712_v45  ;;  %v674_v38 = vmul.f32 0.7978846, %v642_v14  ;;  %v641_v59 = vadd.f32 %v609_v53, %v1803_v30 }
 0x28f   :  { %v1272_v7 = vpop.eup %1271  ;;  %988 = vmatprep.mubr.bf16.mxu1 %v782_v61  ;;  %v725_v6 = vadd.f32 1.0, %v1270_v33  ;;  %v676_v50 = vmul.f32 0.7978846, %v644_v62  ;;  %1285 = vtanh.f32 %v669_v26  ;;  %v643_v22 = vadd.f32 %v611_v48, %v1811_v47 }
 0x290   :  { %v727_v39 = vadd.f32 1.0, %v1272_v7  ;;  %1287 = vtanh.f32 %v671_v5  ;;  %v673_v0 = vmul.f32 0.7978846, %v641_v59  ;;  %v506_v29 = vmul.f32 0.5, %v1736_v17  ;;  %v1872_v59 = vld [vmem:[%s1909_s4] ss:$0 sm:$0xff] }
 0x291   :  { %v757_v4 = vmul.f32 %v725_v6, %v501_v1  ;;  %1289 = vtanh.f32 %v674_v38  ;;  %v675_v41 = vmul.f32 0.7978846, %v643_v22  ;;  %v508_v10 = vmul.f32 0.5, %v1747_v21  ;;  %s1399_s4 = smov [#allocation8]  }
 0x292   :  { %v1274_v24 = vpop.eup %1273  ;;  %v759_v27 = vmul.f32 %v727_v39, %v503_v52  ;;  %1291 = vtanh.f32 %v676_v50  ;;  %v505_v23 = vmul.f32 0.5, %v1731_v2  ;;  %v507_v54 = vmul.f32 0.5, %v1744_v63  ;;  %s1042_s10 = sshll.u32 %s1399_s4, 4  ;;  %s1043_s10 = int_to_ptr.vmem [resolvable:$true] %s1042_s10 }
 0x293   :  { %v1276_v18 = vpop.eup %1275  ;;  %v730_v45 = vadd.f32 1.0, %v1274_v24  ;;  %1293 = vtanh.f32 %v673_v0  ;;  %v510_v21 = vmul.f32 0.5, %v1775_v57  ;;  %v512_v34 = vmul.f32 0.5, %v1789_v3  ;;  %s1363_s11 = scalar_lea.vmem %s1043_s10, 2048  ;;  %p1368_p11 = scmp.lt.s32.totalorder %s1043_s10, %s1043_s10 }
 0x294   :  { %v1278_v11 = vpop.eup %1277  ;;  %v781_v60 = vpack.c.bf16 %v759_v27, %v757_v4  ;;  %v732_v13 = vadd.f32 1.0, %v1276_v18  ;;  %1295 = vtanh.f32 %v675_v41  ;;  %v509_v46 = vmul.f32 0.5, %v1767_v51  ;;  %p1364_p10 = scmp.ne.s32.totalorder %s1043_s10, %s1363_s11  ;;  %p1369_p12 = scmp.lt.s32.totalorder %s1363_s11, %s1363_s11 }
 0x295   :  { %v1280_v25 = vpop.eup %1279  ;;  %v729_v28 = vadd.f32 1.0, %v1278_v11  ;;  %v762_v31 = vmul.f32 %v730_v45, %v506_v29  ;;  %v511_v35 = vmul.f32 0.5, %v1778_v58  ;;  %v514_v57 = vmul.f32 0.5, %v1807_v42 }
 0x296   :  { %989 = vmatmul.mubr.bf16.gmra.mrb[16].mxu1 %v781_v60  ;;  %v764_v32 = vmul.f32 %v732_v13, %v508_v10  ;;  %v731_v19 = vadd.f32 1.0, %v1280_v25  ;;  %v1282_v17 = vpop.eup %1281  ;;  %v516_v62 = vmul.f32 0.5, %v1815_v49  ;;  %v513_v26 = vmul.f32 0.5, %v1803_v30  ;;  %p1370_p13 = por %p1369_p12, %p1368_p11 }
 0x297   :  { %v1284_v37 = vpop.eup %1283  ;;  %v761_v15 = vmul.f32 %v729_v28, %v505_v23  ;;  %v734_v16 = vadd.f32 1.0, %v1282_v17  ;;  %v515_v51 = vmul.f32 0.5, %v1811_v47 }
 0x298   :  { %v784_v9 = vpack.c.bf16 %v764_v32, %v762_v31  ;;  %v763_v56 = vmul.f32 %v731_v19, %v507_v54  ;;  %v736_v36 = vadd.f32 1.0, %v1284_v37  ;;  %p1371_p0 = pnand %p1370_p13, %p1364_p10 }
 0x299   :  { %v1286_v2 = vpop.eup %1285  ;;  %v766_v8 = vmul.f32 %v734_v16, %v510_v21 }
 0x29a   :  { %996 = vmatprep.mubr.bf16.mxu1 %v784_v9  ;;  %v783_v40 = vpack.c.bf16 %v763_v56, %v761_v15  ;;  %v1288_v44 = vpop.eup %1287  ;;  %v768_v20 = vmul.f32 %v736_v36, %v512_v34  ;;  %v733_v12 = vadd.f32 1.0, %v1286_v2 }
 0x29b   :  { %v1290_v63 = vpop.eup %1289  ;;  %v735_v53 = vadd.f32 1.0, %v1288_v44 }
 0x29c   :  { %v1292_v48 = vpop.eup %1291  ;;  %v786_v55 = vpack.c.bf16 %v768_v20, %v766_v8  ;;  %v738_v43 = vadd.f32 1.0, %v1290_v63  ;;  %v765_v61 = vmul.f32 %v733_v12, %v509_v46 }
 0x29d   :  { %v1294_v3 = vpop.eup %1293  ;;  %v767_v14 = vmul.f32 %v735_v53, %v511_v35  ;;  %v740_v33 = vadd.f32 1.0, %v1292_v48 }
 0x29e   :  { %997 = vmatmul.mubr.bf16.gmra.mrb[20].mxu1 %v783_v40  ;;  %v1296_v1 = vpop.eup %1295  ;;  %v737_v58 = vadd.f32 1.0, %v1294_v3  ;;  %v770_v7 = vmul.f32 %v738_v43, %v514_v57 }
 0x29f   :  { %1004 = vmatprep.mubr.bf16.mxu1 %v786_v55  ;;  %v785_v5 = vpack.c.bf16 %v767_v14, %v765_v61  ;;  %v772_v52 = vmul.f32 %v740_v33, %v516_v62  ;;  %v739_v6 = vadd.f32 1.0, %v1296_v1 }
 0x2a0   :  { %v769_v38 = vmul.f32 %v737_v58, %v513_v26 }
 0x2a1   :  { %v788_v42 = vpack.c.bf16 %v772_v52, %v770_v7  ;;  %v771_v50 = vmul.f32 %v739_v6, %v515_v51 }
 0x2a3   :  { %v787_v39 = vpack.c.bf16 %v771_v50, %v769_v38 }
 0x2a6   :  { %1005 = vmatmul.mubr.bf16.gmra.mrb[24].mxu1 %v785_v5 }
 0x2a7   :  { %1012 = vmatprep.mubr.bf16.mxu1 %v788_v42 }
 0x2ae   :  { %1013 = vmatmul.mubr.bf16.gmra.mrb[28].mxu1 %v787_v39 }
 0x339   :  { %v1104_v49 = vpop.f32.mrb[0].mxu1 }
 0x33a   :  { %v1105_v30 = vpop.f32.mrb[1].mxu1 }
 0x33b   :  { %v1106_v47 = vadd.f32 %v1105_v30, %v1104_v49  ;;  %v1107_v22 = vpop.f32.mrb[2].mxu1 }
 0x33c   :  { %v1108_v4 = vpop.f32.mrb[3].mxu1 }
 0x33d   :  { %v959_v24 = vadd.f32 %v1106_v47, %v1872_v59  ;;  %v1109_v27 = vadd.f32 %v1108_v4, %v1107_v22 }
 0x33f   :  { %1021 = vst [vmem:[#allocation8] sm:$0xff] %v959_v24  ;;  %v962_v0 = vadd.f32 %v1109_v27, %v1872_v59 }
 0x341   :  { %1022 = vst [vmem:[#allocation8 + $0x8] sm:$0xff] %v962_v0  ;;  %v1110_v41 = vpop.f32.mrb[4].mxu1 }
 0x342   :  { %v1111_v18 = vpop.f32.mrb[5].mxu1 }
 0x343   :  { %v1112_v29 = vadd.f32 %v1111_v18, %v1110_v41  ;;  %v1113_v45 = vpop.f32.mrb[6].mxu1 }
 0x344   :  { %v1114_v11 = vpop.f32.mrb[7].mxu1 }
 0x345   :  { %v967_v60 = vadd.f32 %v1112_v29, %v1872_v59  ;;  %v1115_v10 = vadd.f32 %v1114_v11, %v1113_v45 }
 0x347   :  { %1023 = vst [vmem:[#allocation8 + $0x10] sm:$0xff] %v967_v60  ;;  %v970_v13 = vadd.f32 %v1115_v10, %v1872_v59 }
 0x349   :  { %1024 = vst [vmem:[#allocation8 + $0x18] sm:$0xff] %v970_v13 }
 0x350   :  { %v1116_v25 = vpop.f32.mrb[8].mxu1 }
 0x351   :  { %v1117_v23 = vpop.f32.mrb[9].mxu1 }
 0x352   :  { %v1118_v28 = vadd.f32 %v1117_v23, %v1116_v25  ;;  %v1119_v31 = vpop.f32.mrb[10].mxu1 }
 0x353   :  { %v1120_v32 = vpop.f32.mrb[11].mxu1 }
 0x354   :  { %v975_v54 = vadd.f32 %v1118_v28, %v1872_v59  ;;  %v1121_v19 = vadd.f32 %v1120_v32, %v1119_v31 }
 0x356   :  { %1025 = vst [vmem:[#allocation8 + $0x20] sm:$0xff] %v975_v54  ;;  %v978_v17 = vadd.f32 %v1121_v19, %v1872_v59 }
 0x358   :  { %1026 = vst [vmem:[#allocation8 + $0x28] sm:$0xff] %v978_v17 }
 0x35c   :  { %v1122_v37 = vpop.f32.mrb[12].mxu1 }
 0x35d   :  { %v1123_v9 = vpop.f32.mrb[13].mxu1 }
 0x35e   :  { %v1124_v15 = vadd.f32 %v1123_v9, %v1122_v37  ;;  %v1125_v56 = vpop.f32.mrb[14].mxu1 }
 0x35f   :  { %v1126_v16 = vpop.f32.mrb[15].mxu1 }
 0x360   :  { %v983_v21 = vadd.f32 %v1124_v15, %v1872_v59  ;;  %v1127_v34 = vadd.f32 %v1126_v16, %v1125_v56 }
 0x362   :  { %1027 = vst [vmem:[#allocation8 + $0x30] sm:$0xff] %v983_v21  ;;  %v986_v36 = vadd.f32 %v1127_v34, %v1872_v59 }
 0x364   :  { %1028 = vst [vmem:[#allocation8 + $0x38] sm:$0xff] %v986_v36 }
 0x369   :  { %v1128_v2 = vpop.f32.mrb[16].mxu1 }
 0x36a   :  { %v1129_v40 = vpop.f32.mrb[17].mxu1 }
 0x36b   :  { %v1130_v44 = vadd.f32 %v1129_v40, %v1128_v2  ;;  %v1131_v8 = vpop.f32.mrb[18].mxu1 }
 0x36c   :  { %v1132_v20 = vpop.f32.mrb[19].mxu1 }
 0x36d   :  { %v991_v12 = vadd.f32 %v1130_v44, %v1872_v59  ;;  %v1133_v63 = vadd.f32 %v1132_v20, %v1131_v8 }
 0x36f   :  { %1029 = vst [vmem:[#allocation8 + $0x40] sm:$0xff] %v991_v12  ;;  %v994_v46 = vadd.f32 %v1133_v63, %v1872_v59 }
 0x371   :  { %1030 = vst [vmem:[#allocation8 + $0x48] sm:$0xff] %v994_v46  ;;  %v1134_v35 = vpop.f32.mrb[20].mxu1 }
 0x372   :  { %v1135_v53 = vpop.f32.mrb[21].mxu1 }
 0x373   :  { %v1136_v48 = vadd.f32 %v1135_v53, %v1134_v35  ;;  %v1137_v55 = vpop.f32.mrb[22].mxu1 }
 0x374   :  { %v1138_v57 = vpop.f32.mrb[23].mxu1 }
 0x375   :  { %v999_v43 = vadd.f32 %v1136_v48, %v1872_v59  ;;  %v1139_v3 = vadd.f32 %v1138_v57, %v1137_v55 }
 0x377   :  { %1031 = vst [vmem:[#allocation8 + $0x50] sm:$0xff] %v999_v43  ;;  %v1002_v61 = vadd.f32 %v1139_v3, %v1872_v59 }
 0x379   :  { %1032 = vst [vmem:[#allocation8 + $0x58] sm:$0xff] %v1002_v61  ;;  %v1140_v14 = vpop.f32.mrb[24].mxu1 }
 0x37a   :  { %v1141_v62 = vpop.f32.mrb[25].mxu1 }
 0x37b   :  { %v1142_v33 = vadd.f32 %v1141_v62, %v1140_v14  ;;  %v1143_v1 = vpop.f32.mrb[26].mxu1 }
 0x37c   :  { %v1144_v26 = vpop.f32.mrb[27].mxu1 }
 0x37d   :  { %v1007_v51 = vadd.f32 %v1142_v33, %v1872_v59  ;;  %v1145_v58 = vadd.f32 %v1144_v26, %v1143_v1 }
 0x37f   :  { %1033 = vst [vmem:[#allocation8 + $0x60] sm:$0xff] %v1007_v51  ;;  %v1010_v5 = vadd.f32 %v1145_v58, %v1872_v59 }
 0x381   :  { %1034 = vst [vmem:[#allocation8 + $0x68] sm:$0xff] %v1010_v5  ;;  %v1146_v7 = vpop.f32.mrb[28].mxu1 }
 0x382   :  { %v1147_v52 = vpop.f32.mrb[29].mxu1 }
 0x383   :  { %v1148_v6 = vadd.f32 %v1147_v52, %v1146_v7  ;;  %v1149_v42 = vpop.f32.mrb[30].mxu1 }
 0x384   :  { %v1150_v38 = vpop.f32.mrb[31].mxu1 }
 0x385   :  { %v1015_v50 = vadd.f32 %v1148_v6, %v1872_v59  ;;  %v1151_v39 = vadd.f32 %v1150_v38, %v1149_v42 }
 0x387   :  { %1035 = vst [vmem:[#allocation8 + $0x70] sm:$0xff] %v1015_v50  ;;  %v1018_v49 = vadd.f32 %v1151_v39, %v1872_v59 }
 0x389   :  { %1036 = vst [vmem:[#allocation8 + $0x78] sm:$0xff] %v1018_v49 }
 0x38a   :  { %1374 = shalt.err (!%p1371_p0)
}
 0x38b   :  { %s1375_s14 = scalar_lea.hbm %s1910_s5, 2048 }
 0x38c   :  { %p1376_p1 = scmp.ne.s32.totalorder %s1910_s5, %s1375_s14  ;;  %p1379_p2 = scmp.lt.u32.totalorder %s1375_s14, %s1910_s5 }
 0x38e   :  { %p1381_p3 = pnand %p1379_p2, %p1376_p1 }
 0x390   :  { %1384 = shalt.err (!%p1381_p3)
}
 0x391   :  { %1048 = dma.vmem_to_hbm [thread:$0]  %s1043_s10, 2048, %s1910_s5, [#allocation4], %s1393_s30, %s1393_s30, %s1394_s6  }
 0x392   :  { %1389 = dma.done.wait [#allocation4], 2048  }
 0x393   :  { %1390 = vsyncadd [#allocation4], 4294965248 }
 0x394   :  { %1052 = vsyncpa [#allocation3], 1 }
 0x395   :  { %1053 = vsyncpa [#allocation6], 1 }
 0x396   :  { %1054 = vsyncpa [#allocation4], 1 }

</bundles_post_ra>
